<compile_context>
chip_gen: v6e
topology: v6e:2x2x1
jax: 0.10.0
libtpu: 0.0.40
codegen_flags: <defaults>
</compile_context>

<pallas_src>
import jax
import jax.numpy as jnp
from jax.experimental import pallas as pl
from jax.experimental.pallas import tpu as pltpu

_EPS = 1e-6                 # matches module default 10**-6
_MIN_GRID_STEPS = 8         # >=8 steps: v7x 2-TC sharding + DMA/compute overlap


def _layernorm_kernel(alpha_ref, bias_ref, x_ref, o_ref):
    # x_ref / o_ref: (tile_rows, H). Each row is normalized over the lane axis.
    x = x_ref[...].astype(jnp.float32)
    h = x.shape[-1]
    mean = jnp.mean(x, axis=-1, keepdims=True)
    diff = x - mean
    # torch.Tensor.std() is the *unbiased* estimator (ddof=1); eps is added to
    # std (outside the sqrt) exactly as in the PyTorch module.
    # TODO(synk): h == 1 divides by zero here, mirroring torch's NaN for
    # std(ddof=1) of a single element.
    var = jnp.sum(diff * diff, axis=-1, keepdims=True) / (h - 1)
    # Per-row scale is (tile_rows, 1) — tiny and off the HBM-bound critical
    # path, so keep the divide exact (no approx reciprocal error).
    scale = alpha_ref[0] / (jnp.sqrt(var) + _EPS)
    o_ref[...] = (diff * scale + bias_ref[0]).astype(o_ref.dtype)


def _smem_spec():
    return pl.BlockSpec(memory_space=pltpu.MemorySpace.SMEM)


def _budgets():
    """Generation-aware (per-buffer tile budget, scoped VMEM limit) in bytes."""
    try:
        vmem_cap = int(pltpu.get_tpu_info().vmem_capacity_bytes)
    except Exception:
        vmem_cap = 64 * 1024 * 1024                  # assume smallest (v7x-like)
    if vmem_cap >= 96 * 1024 * 1024:                 # v5e / v6e: 128 MiB VMEM
        return 8 * 1024 * 1024, 96 * 1024 * 1024
    # v7x: 64 MiB per TensorCore — leave ~16 MiB headroom for the compiler.
    return 4 * 1024 * 1024, min(48 * 1024 * 1024, vmem_cap - 16 * 1024 * 1024)


def _choose_tile_rows(rows, h, tile_budget):
    padded_h = pl.cdiv(h, 128) * 128                 # lanes are 128-padded in VMEM
    # Budget against the f32 compute width of the lane-padded tile; this also
    # covers the in-kernel f32 temporaries (cast x + centered diff).
    by_budget = max(8, (tile_budget // (padded_h * 4)) // 8 * 8)
    # Cap so the grid has >= _MIN_GRID_STEPS steps when the input allows it.
    by_steps = max(8, (rows // _MIN_GRID_STEPS) // 8 * 8)
    tile = min(by_budget, by_steps)
    if tile >= rows:
        return rows                                  # tiny input: one full block
    return tile                                      # multiple of 8; ragged tail OK


def layer_normalization(x, alpha, bias):
    orig_shape = x.shape
    h = orig_shape[-1]
    rows = 1
    for d in orig_shape[:-1]:
        rows *= d
    x2 = x.reshape(rows, h)

    tile_budget, vmem_limit = _budgets()
    tile_rows = _choose_tile_rows(rows, h, tile_budget)
    grid = pl.cdiv(rows, tile_rows)

    out = pl.pallas_call(
        _layernorm_kernel,
        out_shape=jax.ShapeDtypeStruct((rows, h), x.dtype),
        grid_spec=pltpu.PrefetchScalarGridSpec(
            num_scalar_prefetch=0,
            grid=(grid,),
            in_specs=[
                _smem_spec(),                                    # alpha (1,) scalar
                _smem_spec(),                                    # bias  (1,) scalar
                pl.BlockSpec((tile_rows, h), lambda i: (i, 0)),  # x tile
            ],
            out_specs=pl.BlockSpec((tile_rows, h), lambda i: (i, 0)),
        ),
        compiler_params=pltpu.CompilerParams(
            dimension_semantics=("parallel",),
            vmem_limit_bytes=vmem_limit,
        ),
    )(alpha, bias, x2)
    return out.reshape(orig_shape)


def _reference(x, alpha, bias):
    mean = jnp.mean(x, axis=-1, keepdims=True)
    std = jnp.std(x, axis=-1, keepdims=True, ddof=1)
    return alpha[0] * (x - mean) / (std + _EPS) + bias[0]


if __name__ == "__main__":
    key = jax.random.PRNGKey(0)

    # deterministic parameter init (matches nn.Parameter(torch.ones(1)/zeros(1)))
    alpha = jnp.ones((1,), dtype=jnp.float32)
    bias = jnp.zeros((1,), dtype=jnp.float32)

    # small hidden (h < 128): same rows kernel, lane-padded block, multi-step grid
    x_small = jax.random.normal(key, (2, 8, 32), dtype=jnp.float32)
    out_small = jax.block_until_ready(layer_normalization(x_small, alpha, bias))
    assert out_small.shape == x_small.shape
    assert jnp.allclose(out_small, _reference(x_small, alpha, bias), atol=1e-5, rtol=1e-5)

    # larger hidden (h >= 128), multi-step grid
    x_big = jax.random.normal(jax.random.PRNGKey(1), (4, 16, 256), dtype=jnp.float32)
    out_big = jax.block_until_ready(layer_normalization(x_big, alpha, bias))
    assert out_big.shape == x_big.shape
    assert jnp.allclose(out_big, _reference(x_big, alpha, bias), atol=1e-5, rtol=1e-5)

    print("KERNEL_OK")
</pallas_src>

<mosaic_0001>
module attributes {stable_mosaic.version = 11 : i64} {
  func.func @_layernorm_kernel(%arg0: i32, %arg1: memref<1xf32, #tpu.memory_space<smem>>, %arg2: memref<1xf32, #tpu.memory_space<smem>>, %arg3: memref<8x32xf32, #tpu.memory_space<vmem>>, %arg4: memref<8x32xf32, #tpu.memory_space<vmem>>) attributes {dimension_semantics = [#tpu.dimension_semantics<parallel>], iteration_bounds = array<i64: 2>, scalar_prefetch = 0 : i64, scratch_operands = 0 : i64, tpu.core_type = #tpu.core_type<tc>, window_params = [{transform_indices = @transform_0, window_bounds = array<i64: 1>}, {transform_indices = @transform_1, window_bounds = array<i64: 1>}, {transform_indices = @transform_2, window_bounds = array<i64: 8, 32>}, {transform_indices = @transform_3, window_bounds = array<i64: 8, 32>}]} {
    %c0 = arith.constant 0 : index
    %c0_0 = arith.constant 0 : index
    %0 = vector.load %arg3[%c0, %c0_0] : memref<8x32xf32, #tpu.memory_space<vmem>>, vector<8x32xf32>
    %cst = arith.constant dense<0.000000e+00> : vector<8xf32>
    %1 = vector.multi_reduction <add>, %0, %cst [1] : vector<8x32xf32> to vector<8xf32>
    %2 = vector.shape_cast %1 : vector<8xf32> to vector<8x1xf32>
    %cst_1 = arith.constant 3.200000e+01 : f32
    %3 = vector.broadcast %cst_1 : f32 to vector<8x1xf32>
    %4 = arith.divf %2, %3 : vector<8x1xf32>
    %5 = vector.broadcast %4 : vector<8x1xf32> to vector<8x32xf32>
    %6 = arith.subf %0, %5 : vector<8x32xf32>
    %7 = arith.mulf %6, %6 : vector<8x32xf32>
    %cst_2 = arith.constant dense<0.000000e+00> : vector<8xf32>
    %8 = vector.multi_reduction <add>, %7, %cst_2 [1] : vector<8x32xf32> to vector<8xf32>
    %9 = vector.shape_cast %8 : vector<8xf32> to vector<8x1xf32>
    %cst_3 = arith.constant 3.100000e+01 : f32
    %10 = vector.broadcast %cst_3 : f32 to vector<8x1xf32>
    %11 = arith.divf %9, %10 : vector<8x1xf32>
    %c0_4 = arith.constant 0 : index
    %12 = memref.load %arg1[%c0_4] : memref<1xf32, #tpu.memory_space<smem>>
    %13 = math.sqrt %11 : vector<8x1xf32>
    %cst_5 = arith.constant 9.99999997E-7 : f32
    %14 = vector.broadcast %cst_5 : f32 to vector<8x1xf32>
    %15 = arith.addf %13, %14 : vector<8x1xf32>
    %16 = vector.broadcast %12 : f32 to vector<8x1xf32>
    %17 = arith.divf %16, %15 : vector<8x1xf32>
    %18 = vector.broadcast %17 : vector<8x1xf32> to vector<8x32xf32>
    %19 = arith.mulf %6, %18 : vector<8x32xf32>
    %c0_6 = arith.constant 0 : index
    %20 = memref.load %arg2[%c0_6] : memref<1xf32, #tpu.memory_space<smem>>
    %21 = vector.broadcast %20 : f32 to vector<8x32xf32>
    %22 = arith.addf %19, %21 : vector<8x32xf32>
    %c0_7 = arith.constant 0 : index
    %c0_8 = arith.constant 0 : index
    %23 = vector.load %arg4[%c0_7, %c0_8] : memref<8x32xf32, #tpu.memory_space<vmem>>, vector<8x32xf32>
    tpu.vector_store %arg4[%c0_7, %c0_8], %22 {strides = array<i32>} : memref<8x32xf32, #tpu.memory_space<vmem>>, vector<8x32xf32>,
    return
  }
  func.func @transform_0(%arg0: i32) -> i32 {
    %c0_i32 = arith.constant 0 : i32
    %c0_i32_0 = arith.constant 0 : i32
    return %c0_i32 : i32
  }
  func.func @transform_1(%arg0: i32) -> i32 {
    %c0_i32 = arith.constant 0 : i32
    %c0_i32_0 = arith.constant 0 : i32
    return %c0_i32 : i32
  }
  func.func @transform_2(%arg0: i32) -> (i32, i32) {
    %c0_i32 = arith.constant 0 : i32
    %c0_i32_0 = arith.constant 0 : i32
    return %arg0, %c0_i32 : i32, i32
  }
  func.func @transform_3(%arg0: i32) -> (i32, i32) {
    %c0_i32 = arith.constant 0 : i32
    %c0_i32_0 = arith.constant 0 : i32
    return %arg0, %c0_i32 : i32, i32
  }
}

</mosaic_0001>

<bundles_post_ra>
// kernel: tpu_custom_call.1
= control target key start
LH: loop header
LB: loop body
LE: loop exit
PB: predicated region body
PF: predicated region fallthrough
CT: control target
= control target key end

     0   :  { %s635_s0 = inlined_call_operand.<no memory space> [shape: f32[1], index: 0, kind: input, shape index: {}]   ;;  %s636_s1 = inlined_call_operand.<no memory space> [shape: f32[1], index: 1, kind: input, shape index: {}]   ;;  %s637_s2 = inlined_call_operand.hbm [shape: f32[16,32], index: 2, kind: input, shape index: {}]   ;;  %s638_s3 = inlined_call_operand.hbm [shape: f32[16,32], index: 3, kind: output, shape index: {}]  }
   0x1   :  { %8 = sst [smem:[#allocation2]] %s635_s0 }
   0x2   :  { %9 = sst [smem:[#allocation3]] %s636_s1 }
   0x3   :  { %10 = vsyncpa [#allocation5], 0 }
   0x4   :  { %12 = vsyncpa [#allocation5 + $0x1], 0 }
   0x5   :  { %13 = vsyncpa [#allocation6], 0 }
   0x6   :  { %15 = vsyncpa [#allocation6 + $0x1], 0  ;;  %s487_s16 = smov 0   ;;  %s489_s17 = smov 0  }
   0x7   :  { %s491_s18 = smov 0   ;;  %s493_s19 = smov 0  }
   0x8 LB: > { %s508_s0 = sadd.s32 4294967295, %s457_s19   ;;  %s303_s1 = sadd.s32 4294967294, %s457_s19   ;;  %s457_s19 = sphi %s493_s19, %s655_s19   ;;  %s453_s18 = sphi %s491_s18, %s654_s18   ;;  %s449_s17 = sphi %s489_s17, %s653_s17   ;;  %s445_s16 = sphi %s487_s16, %s652_s16  }
   0x9   : > { %s512_s20 = sadd.s32 1, %s457_s19   ;;  %s70_s21 = sadd.s32 1, %s453_s18 }
   0xa   : > { %s67_s22 = ssub.s32 %s457_s19, %s512_s20  ;;  %p77_p0 = scmp.ne.s32.totalorder %s453_s18, %s449_s17 }
   0xb   : > { %p68_p1 = scmp.eq.s32.totalorder %s67_s22, 0  ;;  %p78_p2 = scmp.eq.s32.totalorder %s457_s19, 0 }
   0xc   : > { %p83_p3 = scmp.ne.s32.totalorder %s449_s17, %s445_s16  ;;  %p84_p4 = scmp.eq.s32.totalorder %s508_s0, 0 }
   0xd   : > { %s524_s23 = scalar_select %p68_p1, %s453_s18, %s70_s21  }
   0xe   : > { %p526_p5 = por %p78_p2, %p77_p0  ;;  %p530_p6 = por %p84_p4, %p83_p3 }
   0xf   : > { %p107_p7 = scmp.eq.s32.totalorder %s508_s0, 1  ;;  %p113_p8 = scmp.eq.s32.totalorder %s303_s1, 1 }
  0x10   : > { %s642_s25 = scalar_select %p530_p6, 1, 0 }
  0x11   : > { %p327_p10 = scmp.lt.s32.totalorder %s457_s19, 2  ;;  %p537_p11 = por %p107_p7, %p77_p0 }
  0x12   : > { %p541_p12 = por %p113_p8, %p83_p3  ;;  %s139_s28 = sand.u32 1, %s453_s18  }
  0x13   : > { %s643_s26 = scalar_select %p537_p11, 1, 0 }
  0x14   : > { %s644_s27 = scalar_select %p541_p12, 1, 0 }
  0x15   : > { %s307_s29 = sshll.u32 %s457_s19, 7  ;;  %s306_s30 = sshll.u32 %s139_s28, 3 }
  0x16   : > { %s550_s6 = scalar_lea.hbm %s637_s2, %s307_s29  ;;  %s143_s7 = scalar_lea.vmem [#allocation4], %s306_s30 }
  0x17   : > { %s150_s8 = sshll.u32 %s143_s7, 4  ;;  %p554_p13 = pnand %p327_p10, %p526_p5  ;;  %s558_s8 = int_to_ptr.vmem [resolvable:$true] %s150_s8 }
  0x18   : > { %s140_s10 = scalar_lea.sflag [#allocation5], %s139_s28  ;;  %s365_s11 = scalar_lea.hbm %s550_s6, 128 }
  0x19   : > { %p366_p2 = scmp.ne.s32.totalorder %s550_s6, %s365_s11  ;;  %p367_p3 = pneg %p554_p13 }
  0x1a   : > { %s370_s14 = scalar_lea.hbm %s637_s2, 256  ;;  %p371_p5 = scmp.lt.s32.totalorder %s550_s6, %s637_s2 }
  0x1b   : > { %p368_p4 = pnand %p367_p3, %p366_p2  ;;  %p372_p8 = scmp.lt.s32.totalorder %s370_s14, %s365_s11 }
  0x1d   : > { %p369_p7 = pneg %p368_p4  ;;  %p373_p10 = por %p372_p8, %p371_p5 }
  0x1f   : > { %p374_p9 = pnand %p373_p10, %p369_p7 }
  0x21   : > { %377 = shalt.err (!%p374_p9)
}
  0x22   : > { %s378_s21 = scalar_lea.vmem %s558_s8, 128  ;;  %s459_s22 = smov [#allocation4]  }
  0x23   : > { %p379_p0 = scmp.ne.s32.totalorder %s558_s8, %s378_s21  ;;  %s383_s24 = sshll.u32 %s459_s22, 4  ;;  %s384_s24 = int_to_ptr.vmem [resolvable:$false] %s383_s24 }
  0x24   : > { %s385_s28 = scalar_lea.vmem %s384_s24, 256  ;;  %p386_p4 = scmp.lt.s32.totalorder %s558_s8, %s384_s24 }
  0x25   : > { %p381_p1 = pnand %p379_p0, %p367_p3  ;;  %p387_p12 = scmp.lt.s32.totalorder %s385_s28, %s378_s21 }
  0x27   : > { %p382_p2 = pneg %p381_p1  ;;  %p388_p11 = por %p387_p12, %p386_p4 }
  0x29   : > { %p389_p6 = pnand %p388_p11, %p382_p2 }
  0x2b   : > { %392 = shalt.err (!%p389_p6)
}
  0x2c   : > { %322 = dma.hbm_to_vmem [thread:$0]  (!%p554_p13), %s550_s6, 128, %s558_s8, %s140_s10  }
  0x2d   : > { %p646_p9 = scmp.lt.s32.totalorder %s457_s19, 3  ;;  %p647_p7 = scmp.ge.s32.totalorder %s457_s19, 1 }
  0x2f   : > { %p156_p0 = pnand %p647_p7, %p646_p9 }
  0x30   : > { %s585_s29 = sand.u32 (!%p156_p0), 1, %s449_s17   ;;  %p648_p6 = scmp.ne.s32.totalorder (!%p156_p0), %s642_s25, 0 }
  0x31   : > { %159 = sbr.rel (%p156_p0) target bundleno = 395 (0x18b), region = 32  ;;  %s309_s30 = sshll.u32 (!%p156_p0), %s585_s29, 3 }
  0x32   : > { %s162_s4 = scalar_lea.sflag (!%p156_p0), [#allocation5], %s585_s29  ;;  %s165_s5 = scalar_lea.vmem (!%p156_p0), [#allocation4], %s309_s30 }
  0x36   : > { %436 = dma.done.wait (%p648_p6), %s162_s4, 128  }
  0x37   : > { %438 = vsyncadd (%p648_p6), %s162_s4, 4294967168  ;;  %vm189_vm0 = vcmask 261120   ;;  %v188_v0 = vld [vmem:[%s165_s5] sm:$0xff]  ;;  %s202_s25 = sld [smem:[#allocation2]]  ;;  %s312_s7 = sshll.u32 %s508_s0, 7 }
  0x38   : > { %v190_v1 = vsel %vm189_vm0, %v188_v0, 0.0  ;;  %s215_s6 = sld [smem:[#allocation3]]  ;;  %s187_s8 = scalar_lea.vmem [#allocation7], %s309_s30 }
  0x39   : > { %191 = vadd.xlane.f32.xlu0 %v190_v1  ;;  %s233_s9 = sshll.u32 %s187_s8, 4  ;;  %s231_s12 = scalar_lea.hbm %s638_s3, %s312_s7  ;;  %s234_s9 = int_to_ptr.vmem [resolvable:$true] %s233_s9 }
  0x3a   : > { %s220_s13 = scalar_lea.sflag [#allocation6], %s585_s29  ;;  %s393_s14 = scalar_lea.vmem %s234_s9, 128 }
  0x3b   : > { %p394_p11 = scmp.ne.s32.totalorder %s234_s9, %s393_s14  ;;  %p649_p12 = scmp.ne.s32.totalorder %s643_s26, 0 }
  0x3c   : > { %s460_s15 = smov [#allocation7]  }
  0x3d   : > { %v211_v15 = vstv %s202_s25  ;;  %p395_p13 = pnand %p394_p11, %p649_p12  ;;  %s397_s0 = sshll.u32 %s460_s15, 4  ;;  %s398_s0 = int_to_ptr.vmem [resolvable:$false] %s397_s0 }
  0x3e   : > { %v216_v18 = vstv %s215_s6  ;;  %s399_s1 = scalar_lea.vmem %s398_s0, 256  ;;  %p400_p3 = scmp.lt.s32.totalorder %s234_s9, %s398_s0 }
  0x3f   : > { %p396_p1 = pneg %p395_p13  ;;  %p401_p5 = scmp.lt.s32.totalorder %s399_s1, %s393_s14 }
  0x41   : > { %p402_p8 = por %p401_p5, %p400_p3 }
  0x43   : > { %p403_p10 = pnand %p402_p8, %p396_p1 }
  0xc2   : > { %v192_v2 = vpop.xlane.xlu0 %191 }
  0xc3   : > { %v194_v3 = vmul.f32 0.03125, %v192_v2 }
  0xc5   : > { %v195_v4 = vsub.f32 %v188_v0, %v194_v3 }
  0xc7   : > { %v196_v5 = vmul.f32 %v195_v4, %v195_v4 }
  0xc9   : > { %v197_v6 = vsel %vm189_vm0, %v196_v5, 0.0 }
  0xca   : > { %198 = vadd.xlane.f32.xlu0 %v197_v6 }
 0x153   : > { %v199_v7 = vpop.xlane.xlu0 %198 }
 0x154   : > { %v201_v8 = vmul.f32 0.032258064, %v199_v7 }
 0x156   : > { %361 = vrsqrt.f32 %v201_v8  ;;  %vm205_vm1 = vcmp.eq.f32.partialorder %v201_v8, inf  ;;  %v208_v11 = vand.u32 2147483648, %v201_v8  ;;  %vm207_vm2 = vcmp.eq.f32.partialorder %v201_v8, 0.0 }
 0x163   : > { %v362_v9 = vpop.eup %361 }
 0x164   : > { %v204_v10 = vmul.f32 %v362_v9, %v201_v8 }
 0x166   : > { %v206_v12 = vsel %vm205_vm1, %v201_v8, %v204_v10 }
 0x167   : > { %v209_v13 = vsel %vm207_vm2, %v208_v11, %v206_v12 }
 0x168   : > { %v210_v14 = vadd.f32 1e-06, %v209_v13 }
 0x16a   : > { %363 = vrcp.f32 %v210_v14 }
 0x177   : > { %v364_v16 = vpop.eup %363 }
 0x178   : > { %v213_v17 = vmul.f32 %v364_v16, %v211_v15 }
 0x17a   : > { %v214_v19 = vmul.f32 %v213_v17, %v195_v4 }
 0x17c   : > { %v217_v20 = vadd.f32 %v216_v18, %v214_v19 }
 0x17e   : > { %218 = vst.msk [vmem:[%s187_s8] sm:$0xff] %vm189_vm0, %v217_v20 }
 0x17f   : > { %406 = shalt.err (!%p403_p10)
}
 0x180   : > { %s407_s21 = scalar_lea.hbm %s231_s12, 128  ;;  %s411_s28 = scalar_lea.hbm %s638_s3, 256 }
 0x181   : > { %p408_p2 = scmp.ne.s32.totalorder %s231_s12, %s407_s21  ;;  %p412_p7 = scmp.lt.s32.totalorder %s231_s12, %s638_s3 }
 0x182   : > { %p413_p0 = scmp.lt.s32.totalorder %s411_s28, %s407_s21 }
 0x183   : > { %p409_p4 = pnand %p408_p2, %p649_p12 }
 0x184   : > { %p414_p6 = por %p413_p0, %p412_p7 }
 0x185   : > { %p410_p9 = pneg %p409_p4 }
 0x187   : > { %p415_p11 = pnand %p414_p6, %p410_p9 }
 0x189   : > { %418 = shalt.err (!%p415_p11)
}
 0x18a   : > { %317 = dma.vmem_to_hbm [thread:$0]  (%p649_p12), %s234_s9, 128, %s231_s12, %s220_s13  }
 0x18b PF: > { %s245_s4 = sand.u32 1, %s445_s16   ;;  %p650_p13 = scmp.ne.s32.totalorder %s644_s27, 0 }
 0x18c   : > { %p651_p1 = scmp.ge.s32.totalorder %s457_s19, 2  ;;  %s246_s5 = scalar_lea.sflag [#allocation6], %s245_s4 }
 0x18e   : > { %p324_p3 = pnand %p651_p1, %p650_p13 }
 0x190   : > { %p325_p5 = pneg %p324_p3 }
 0x192   : > { %440 = dma.done.wait (%p325_p5), %s246_s5, 128  }
 0x193   : > { %442 = vsyncadd (%p325_p5), %s246_s5, 4294967168  ;;  %p18_p8 = scmp.ge.s32.totalorder %s512_s20, 4   ;;  %s652_s16 = smov %s449_s17 }
 0x194   : > { %s653_s17 = smov %s453_s18  ;;  %s654_s18 = smov %s524_s23 }
 0x195   : > { %s655_s19 = smov %s512_s20  ;;  %20 = sbr.rel (!%p18_p8) target bundleno = 8 (0x8), region = 77 }
 0x19a   :  { %251 = vsyncpa [#allocation5], 1 }
 0x19b   :  { %253 = vsyncpa [#allocation5 + $0x1], 1 }
 0x19c   :  { %254 = vsyncpa [#allocation6], 1 }
 0x19d   :  { %256 = vsyncpa [#allocation6 + $0x1], 1 }

</bundles_post_ra>
